<compile_context>
chip_gen: v7x
topology: tpu7x:2x2x1
jax: 0.10.0
libtpu: 0.0.40
codegen_flags: <defaults>
</compile_context>

<pallas_src>
import functools

import jax
import jax.numpy as jnp
import numpy as np
from jax.experimental import pallas as pl
from jax.experimental.pallas import tpu as pltpu

OUT_PAD = 128  # pad fc2 output columns to a full lane width


def dnn_kernel(x_ref, w1_ref, b1_ref, w2_ref, b2_ref, o_ref):
    # fc1: [TB, In](bf16) @ [In, H](bf16) -> f32, bias-add + ReLU in f32.
    h = jnp.dot(x_ref[...], w1_ref[...], preferred_element_type=jnp.float32) + b1_ref[...]
    h = jnp.maximum(h, 0.0)
    # fc2: cast activation to bf16 for the MXU, accumulate in f32, lane-dense store.
    o_ref[...] = (
        jnp.dot(h.astype(w2_ref.dtype), w2_ref[...], preferred_element_type=jnp.float32)
        + b2_ref[...]
    ).astype(o_ref.dtype)


def prepare_dnn_params(w1, b1, w2, b2):
    """One-time parameter prep (hoisted out of the forward path).

    w1: [H, In]  (PyTorch nn.Linear layout), b1: [H]
    w2: [Out, H],                            b2: [Out]
    Returns kernel-ready params:
      w1_t   [In, H]      bf16
      b1_2d  [1, H]       f32
      w2_tp  [H, OUT_PAD] bf16   (zero-padded columns beyond Out)
      b2_2d  [1, OUT_PAD] f32    (zero-padded)
      out_size (python int)
    """
    w1 = jnp.asarray(w1, jnp.float32)
    w2 = jnp.asarray(w2, jnp.float32)
    out_size, hidden = w2.shape

    w1_t = w1.T.astype(jnp.bfloat16)                       # [In, H]
    b1_2d = jnp.asarray(b1, jnp.float32)[None, :]          # [1, H]

    w2_tp = jnp.zeros((hidden, OUT_PAD), jnp.float32)
    w2_tp = w2_tp.at[:, :out_size].set(w2.T).astype(jnp.bfloat16)  # [H, OUT_PAD]
    b2_2d = jnp.zeros((1, OUT_PAD), jnp.float32)
    b2_2d = b2_2d.at[:, :out_size].set(jnp.asarray(b2, jnp.float32))

    return w1_t, b1_2d, w2_tp, b2_2d, out_size


@functools.partial(jax.jit, static_argnames=("out_size", "tb"))
def dnn_forward(x, w1_t, b1_2d, w2_tp, b2_2d, *, out_size, tb=128):
    """x: [B, In] float32. Returns [B, out_size] float32."""
    B, In = x.shape
    H = w1_t.shape[1]

    x_bf = x.astype(jnp.bfloat16)
    tb = tb if B >= tb else B          # full-extent block if batch is tiny
    grid = (pl.cdiv(B, tb),)

    cost = pl.CostEstimate(
        flops=2 * B * (In * H + H * OUT_PAD),
        transcendentals=0,
        bytes_accessed=(
            B * In * 2            # x (bf16)
            + In * H * 2          # w1 (bf16)
            + H * 4               # b1 (f32)
            + H * OUT_PAD * 2     # w2 (bf16)
            + OUT_PAD * 4         # b2 (f32)
            + B * OUT_PAD * 4     # out (f32)
        ),
    )

    out_padded = pl.pallas_call(
        dnn_kernel,
        out_shape=jax.ShapeDtypeStruct((B, OUT_PAD), jnp.float32),
        grid_spec=pltpu.PrefetchScalarGridSpec(
            num_scalar_prefetch=0,
            grid=grid,
            in_specs=[
                pl.BlockSpec((tb, In), lambda i: (i, 0)),        # x streams over batch
                pl.BlockSpec((In, H), lambda i: (0, 0)),         # weights stay resident
                pl.BlockSpec((1, H), lambda i: (0, 0)),
                pl.BlockSpec((H, OUT_PAD), lambda i: (0, 0)),
                pl.BlockSpec((1, OUT_PAD), lambda i: (0, 0)),
            ],
            out_specs=pl.BlockSpec((tb, OUT_PAD), lambda i: (i, 0)),
        ),
        compiler_params=pltpu.CompilerParams(
            dimension_semantics=("parallel",),  # v7x: shard batch tiles across both TCs
        ),
        cost_estimate=cost,
    )(x_bf, w1_t, b1_2d, w2_tp, b2_2d)

    return out_padded[:, :out_size]


if __name__ == "__main__":
    # Shapes consistent with the module: input_size from x_train features,
    # hidden_size=128 (as in the script), output_size from y_train columns.
    batch = 256          # multiple of the 128-row batch tile -> 2 pipelined grid steps
    input_size = 8       # e.g. 8 UWB anchor range measurements
    hidden_size = 128
    output_size = 3      # e.g. (x, y, z) position

    key = jax.random.PRNGKey(0)
    kx, kw1, kb1, kw2, kb2 = jax.random.split(key, 5)

    x = jax.random.normal(kx, (batch, input_size), dtype=jnp.float32)

    # Deterministic init mimicking nn.Linear's uniform(-1/sqrt(fan_in), 1/sqrt(fan_in)).
    bound1 = 1.0 / np.sqrt(input_size)
    w1 = jax.random.uniform(kw1, (hidden_size, input_size), minval=-bound1, maxval=bound1)
    b1 = jax.random.uniform(kb1, (hidden_size,), minval=-bound1, maxval=bound1)
    bound2 = 1.0 / np.sqrt(hidden_size)
    w2 = jax.random.uniform(kw2, (output_size, hidden_size), minval=-bound2, maxval=bound2)
    b2 = jax.random.uniform(kb2, (output_size,), minval=-bound2, maxval=bound2)

    # One-time parameter prep (transposes / padding hoisted out of the hot path).
    w1_t, b1_2d, w2_tp, b2_2d, out_size = prepare_dnn_params(w1, b1, w2, b2)

    out = dnn_forward(x, w1_t, b1_2d, w2_tp, b2_2d, out_size=out_size)
    out = jax.block_until_ready(out)

    # Reference (plain JAX) mimicking the kernel's bf16 input rounding with f32 accumulation.
    x_r = x.astype(jnp.bfloat16).astype(jnp.float32)
    w1_r = jnp.asarray(w1, jnp.float32).astype(jnp.bfloat16).astype(jnp.float32)
    w2_r = jnp.asarray(w2, jnp.float32).astype(jnp.bfloat16).astype(jnp.float32)
    h_r = jnp.maximum(x_r @ w1_r.T + jnp.asarray(b1, jnp.float32), 0.0)
    h_r = h_r.astype(jnp.bfloat16).astype(jnp.float32)
    ref = h_r @ w2_r.T + jnp.asarray(b2, jnp.float32)
    np.testing.assert_allclose(np.asarray(out), np.asarray(ref), rtol=5e-3, atol=5e-3)

    # Also sanity-check against the full-f32 PyTorch-equivalent forward (loose tol for bf16).
    ref_f32 = jnp.maximum(x @ jnp.asarray(w1, jnp.float32).T + b1, 0.0) @ jnp.asarray(
        w2, jnp.float32).T + b2
    np.testing.assert_allclose(np.asarray(out), np.asarray(ref_f32), rtol=3e-2, atol=3e-2)

    print("KERNEL_OK")
</pallas_src>

<mosaic_0001>
module attributes {stable_mosaic.version = 11 : i64} {
  func.func @dnn_kernel(%arg0: i32, %arg1: memref<128x8xbf16, #tpu.memory_space<vmem>>, %arg2: memref<8x128xbf16, #tpu.memory_space<vmem>>, %arg3: memref<1x128xf32, #tpu.memory_space<vmem>>, %arg4: memref<128x128xbf16, #tpu.memory_space<vmem>>, %arg5: memref<1x128xf32, #tpu.memory_space<vmem>>, %arg6: memref<128x128xf32, #tpu.memory_space<vmem>>) attributes {dimension_semantics = [#tpu.dimension_semantics<parallel>], iteration_bounds = array<i64: 2>, scalar_prefetch = 0 : i64, scratch_operands = 0 : i64, tpu.core_type = #tpu.core_type<tc>, window_params = [{transform_indices = @transform_0, window_bounds = array<i64: 128, 8>}, {pipeline_mode = #tpu.pipeline_mode<synchronous>, transform_indices = @transform_1, window_bounds = array<i64: 8, 128>}, {pipeline_mode = #tpu.pipeline_mode<synchronous>, transform_indices = @transform_2, window_bounds = array<i64: 1, 128>}, {pipeline_mode = #tpu.pipeline_mode<synchronous>, transform_indices = @transform_3, window_bounds = array<i64: 128, 128>}, {pipeline_mode = #tpu.pipeline_mode<synchronous>, transform_indices = @transform_4, window_bounds = array<i64: 1, 128>}, {transform_indices = @transform_5, window_bounds = array<i64: 128, 128>}]} {
    %c0 = arith.constant 0 : index
    %c0_0 = arith.constant 0 : index
    %0 = vector.load %arg1[%c0, %c0_0] : memref<128x8xbf16, #tpu.memory_space<vmem>>, vector<128x8xbf16>
    %c0_1 = arith.constant 0 : index
    %c0_2 = arith.constant 0 : index
    %1 = vector.load %arg2[%c0_1, %c0_2] : memref<8x128xbf16, #tpu.memory_space<vmem>>, vector<8x128xbf16>
    %cst = arith.constant dense<0.000000e+00> : vector<128x128xf32>
    %2 = tpu.matmul %0, %1, %cst {dimension_numbers = #tpu.dot_dimension_numbers<[1], [0], [0], [1], [0, 0, 1, 1], [], []>} : vector<128x8xbf16>, vector<8x128xbf16>, vector<128x128xf32> -> vector<128x128xf32>
    %c0_3 = arith.constant 0 : index
    %c0_4 = arith.constant 0 : index
    %3 = vector.load %arg3[%c0_3, %c0_4] : memref<1x128xf32, #tpu.memory_space<vmem>>, vector<1x128xf32>
    %4 = vector.broadcast %3 : vector<1x128xf32> to vector<128x128xf32>
    %5 = arith.addf %2, %4 : vector<128x128xf32>
    %cst_5 = arith.constant 0.000000e+00 : f32
    %6 = vector.broadcast %cst_5 : f32 to vector<128x128xf32>
    %7 = arith.maximumf %5, %6 : vector<128x128xf32>
    %8 = arith.truncf %7 : vector<128x128xf32> to vector<128x128xbf16>
    %c0_6 = arith.constant 0 : index
    %c0_7 = arith.constant 0 : index
    %9 = vector.load %arg4[%c0_6, %c0_7] : memref<128x128xbf16, #tpu.memory_space<vmem>>, vector<128x128xbf16>
    %cst_8 = arith.constant dense<0.000000e+00> : vector<128x128xf32>
    %10 = tpu.matmul %8, %9, %cst_8 {dimension_numbers = #tpu.dot_dimension_numbers<[1], [0], [0], [1], [0, 0, 1, 1], [], []>} : vector<128x128xbf16>, vector<128x128xbf16>, vector<128x128xf32> -> vector<128x128xf32>
    %c0_9 = arith.constant 0 : index
    %c0_10 = arith.constant 0 : index
    %11 = vector.load %arg5[%c0_9, %c0_10] : memref<1x128xf32, #tpu.memory_space<vmem>>, vector<1x128xf32>
    %12 = vector.broadcast %11 : vector<1x128xf32> to vector<128x128xf32>
    %13 = arith.addf %10, %12 : vector<128x128xf32>
    %c0_11 = arith.constant 0 : index
    %c0_12 = arith.constant 0 : index
    %14 = vector.load %arg6[%c0_11, %c0_12] : memref<128x128xf32, #tpu.memory_space<vmem>>, vector<128x128xf32>
    tpu.vector_store %arg6[%c0_11, %c0_12], %13 {strides = array<i32>} : memref<128x128xf32, #tpu.memory_space<vmem>>, vector<128x128xf32>,
    return
  }
  func.func @transform_0(%arg0: i32) -> (i32, i32) {
    %c0_i32 = arith.constant 0 : i32
    %c0_i32_0 = arith.constant 0 : i32
    return %arg0, %c0_i32 : i32, i32
  }
  func.func @transform_1(%arg0: i32) -> (i32, i32) {
    %c0_i32 = arith.constant 0 : i32
    %c0_i32_0 = arith.constant 0 : i32
    %c0_i32_1 = arith.constant 0 : i32
    return %c0_i32, %c0_i32_0 : i32, i32
  }
  func.func @transform_2(%arg0: i32) -> (i32, i32) {
    %c0_i32 = arith.constant 0 : i32
    %c0_i32_0 = arith.constant 0 : i32
    %c0_i32_1 = arith.constant 0 : i32
    return %c0_i32, %c0_i32_0 : i32, i32
  }
  func.func @transform_3(%arg0: i32) -> (i32, i32) {
    %c0_i32 = arith.constant 0 : i32
    %c0_i32_0 = arith.constant 0 : i32
    %c0_i32_1 = arith.constant 0 : i32
    return %c0_i32, %c0_i32_0 : i32, i32
  }
  func.func @transform_4(%arg0: i32) -> (i32, i32) {
    %c0_i32 = arith.constant 0 : i32
    %c0_i32_0 = arith.constant 0 : i32
    %c0_i32_1 = arith.constant 0 : i32
    return %c0_i32, %c0_i32_0 : i32, i32
  }
  func.func @transform_5(%arg0: i32) -> (i32, i32) {
    %c0_i32 = arith.constant 0 : i32
    %c0_i32_0 = arith.constant 0 : i32
    return %arg0, %c0_i32 : i32, i32
  }
}

</mosaic_0001>

<bundles_post_ra>
// kernel: dnn_forward.1
= control target key start
LH: loop header
LB: loop body
LE: loop exit
PB: predicated region body
PF: predicated region fallthrough
CT: control target
= control target key end

     0   :  { %s874_s18 = smov 0   ;;  %s964_s0 = inlined_call_operand.vmem [shape: bf16[256,8], index: 0, kind: input, shape index: {}]   ;;  %s965_s1 = inlined_call_operand.vmem [shape: bf16[8,128], index: 1, kind: input, shape index: {}]   ;;  %s966_s2 = inlined_call_operand.vmem [shape: f32[1,128], index: 2, kind: input, shape index: {}]   ;;  %s967_s3 = inlined_call_operand.vmem [shape: bf16[128,128], index: 3, kind: input, shape index: {}]   ;;  %s968_s4 = inlined_call_operand.vmem [shape: f32[1,128], index: 4, kind: input, shape index: {}]   ;;  %s969_s5 = inlined_call_operand.vmem [shape: f32[256,128], index: 5, kind: output, shape index: {}]  }
   0x1 LB: > { %s683_s19 = sadd.s32 4294967295, %s842_s18   ;;  %p687_p0 = scmp.ge.s32.totalorder %s842_s18, 1  ;;  %s842_s18 = sphi %s874_s18, %s15_s18  }
   0x2   : > { %p188_p1 = scmp.lt.s32.totalorder %s842_s18, 3 }
   0x4   : > { %p189_p2 = pnand %p687_p0, %p188_p1 }
   0x5   : > { %v245_v0 = vld [vmem:[%s965_s1] sm:$0xf] (!%p189_p2)  ;;  %vm318_vm0 = vcmask (!%p189_p2), 1043456   ;;  %s688_s22 = sshll.u32 (!%p189_p2), %s683_s19, 4  ;;  %v829_v3 = vld [vmem:[%s967_s3 + $0x8] sm:$0xff] (!%p189_p2)   ;;  %vm293_vm1 = vcmask (!%p189_p2), 64512  }
   0x6   : > { %192 = sbr.rel (%p189_p2) target bundleno = 482 (0x1e2), region = 40  ;;  %v828_v1 = vld [vmem:[%s967_s3] sm:$0xff] (!%p189_p2)   ;;  %811 = vmatprep.subr.msk.bf16.mxu0 (!%p189_p2), %vm318_vm0, %v245_v0  ;;  %v320_v2 = vsel (!%p189_p2), %vm318_vm0, %v245_v0, 0  ;;  %p217_p3 = scmp.lt.s32.totalorder (!%p189_p2), %s688_s22, 31  ;;  %v830_v4 = vld [vmem:[%s967_s3 + $0x10] sm:$0xff] (!%p189_p2)   ;;  %v831_v8 = vld [vmem:[%s967_s3 + $0x18] sm:$0xff] (!%p189_p2)  }
   0x7   : > { %746 = vmatpush3.bf16.msra.mxu0 (!%p189_p2), %v320_v2  ;;  %795 = vmatprep.subr.bf16.mxu1 (!%p189_p2), %v828_v1  ;;  %v832_v10 = vld [vmem:[%s967_s3 + $0x20] sm:$0xff] (!%p189_p2)   ;;  %v833_v12 = vld [vmem:[%s967_s3 + $0x28] sm:$0xff] (!%p189_p2)   ;;  %v834_v16 = vld [vmem:[%s967_s3 + $0x30] sm:$0xff] (!%p189_p2)  }
   0x8   : > { %763 = vmatprep.subr.bf16.mxu0 (!%p189_p2), %v828_v1  ;;  %803 = vmatpush3.bf16.msra.mxu1 (!%p189_p2), %v828_v1  ;;  %v835_v17 = vld [vmem:[%s967_s3 + $0x38] sm:$0xff] (!%p189_p2)   ;;  %v692_v18 = vld [vmem:[%s966_s2] ss:$0 sm:$0xff] (!%p189_p2) }
   0x9   : > { %796 = vmatprep.subr.bf16.mxu1 (!%p189_p2), %v829_v3 }
   0xc   : > { %804 = vmatpush3.bf16.msra.mxu1 (!%p189_p2), %v829_v3 }
   0xd   : > { %s971_s22 = smov (!%p217_p3, %s688_s22), 31  ;;  %797 = vmatprep.subr.bf16.mxu1 %v830_v4 }
   0xe   : > { %s689_s27 = sshll.u32 %s971_s22, 2  ;;  %s691_s21 = sshll.u32 %s971_s22, 3 }
   0xf   : > { %s897_s30 = scalar_lea.vmem %s964_s0, %s689_s27  ;;  %s943_s27 = scalar_lea.vmem %s969_s5, %s691_s21 }
  0x10   : > { %v820_v5 = vld [vmem:[%s897_s30] sm:$0xff]   ;;  %v821_v6 = vld [vmem:[%s897_s30 + $0x8] sm:$0xff]   ;;  %v822_v7 = vld [vmem:[%s897_s30 + $0x10] sm:$0xff]   ;;  %805 = vmatpush3.bf16.msra.mxu1 %v830_v4 }
  0x11   : > { %747 = vmatprep.mubr.msk.bf16.mxu0 %vm293_vm1, %v820_v5  ;;  %v823_v9 = vld [vmem:[%s897_s30 + $0x18] sm:$0xff]   ;;  %798 = vmatprep.subr.bf16.mxu1 %v831_v8  ;;  %v824_v11 = vld [vmem:[%s897_s30 + $0x20] sm:$0xff]   ;;  %v825_v13 = vld [vmem:[%s897_s30 + $0x28] sm:$0xff]  }
  0x12   : > { %748 = vmatmul.mubr.msk.bf16.vlgmr.msra.gmra.mrb[0].mxu0 %vm293_vm1, %v821_v6  ;;  %v826_v14 = vld [vmem:[%s897_s30 + $0x30] sm:$0xff]   ;;  %v827_v15 = vld [vmem:[%s897_s30 + $0x38] sm:$0xff]  }
  0x13   : > { %751 = vmatprep.mubr.msk.bf16.mxu0 %vm293_vm1, %v822_v7  ;;  %764 = vmatpush3.bf16.msra.mxu0 %v828_v1 }
  0x14   : > { %765 = vmatprep.subr.bf16.mxu0 %v829_v3  ;;  %806 = vmatpush3.bf16.msra.mxu1 %v831_v8 }
  0x15   : > { %799 = vmatprep.subr.bf16.mxu1 %v832_v10 }
  0x17   : > { %766 = vmatpush3.bf16.msra.mxu0 %v829_v3 }
  0x18   : > { %767 = vmatprep.subr.bf16.mxu0 %v830_v4  ;;  %807 = vmatpush3.bf16.msra.mxu1 %v832_v10 }
  0x19   : > { %800 = vmatprep.subr.bf16.mxu1 %v833_v12 }
  0x1a   : > { %752 = vmatmul.mubr.msk.bf16.gmra.mrb[4].mxu0 %vm293_vm1, %v823_v9 }
  0x1b   : > { %755 = vmatprep.mubr.msk.bf16.mxu0 %vm293_vm1, %v824_v11  ;;  %768 = vmatpush3.bf16.msra.mxu0 %v830_v4  ;;  %v709_v11 = vld [vmem:[%s968_s4] ss:$0 sm:$0xff] }
  0x1c   : > { %769 = vmatprep.subr.bf16.mxu0 %v831_v8  ;;  %808 = vmatpush3.bf16.msra.mxu1 %v833_v12 }
  0x1d   : > { %801 = vmatprep.subr.bf16.mxu1 %v834_v16 }
  0x1f   : > { %770 = vmatpush3.bf16.msra.mxu0 %v831_v8 }
  0x20   : > { %771 = vmatprep.subr.bf16.mxu0 %v832_v10  ;;  %809 = vmatpush3.bf16.msra.mxu1 %v834_v16 }
  0x21   : > { %802 = vmatprep.subr.bf16.mxu1 %v835_v17 }
  0x22   : > { %756 = vmatmul.mubr.msk.bf16.gmra.mrb[8].mxu0 %vm293_vm1, %v825_v13 }
  0x23   : > { %759 = vmatprep.mubr.msk.bf16.mxu0 %vm293_vm1, %v826_v14  ;;  %772 = vmatpush3.bf16.msra.mxu0 %v832_v10 }
  0x24   : > { %773 = vmatprep.subr.bf16.mxu0 %v833_v12  ;;  %810 = vmatpush3.bf16.msra.mxu1 %v835_v17 }
  0x27   : > { %774 = vmatpush3.bf16.msra.mxu0 %v833_v12 }
  0x28   : > { %775 = vmatprep.subr.bf16.mxu0 %v834_v16 }
  0x2a   : > { %760 = vmatmul.mubr.msk.bf16.gmra.mrb[12].mxu0 %vm293_vm1, %v827_v15 }
  0x2b   : > { %776 = vmatpush3.bf16.msra.mxu0 %v834_v16 }
  0x2c   : > { %777 = vmatprep.subr.bf16.mxu0 %v835_v17 }
  0x2f   : > { %778 = vmatpush3.bf16.msra.mxu0 %v835_v17 }
  0xe5   : > { %v749_v19 = vpop.f32.mrb[0].mxu0 }
  0xe6   : > { %v365_v20 = vadd.f32 %v749_v19, %v692_v18  ;;  %v356_v21 = vpop.f32.mrb[1].mxu0 }
  0xe7   : > { %v357_v22 = vadd.f32 %v692_v18, %v356_v21  ;;  %v750_v23 = vpop.f32.mrb[2].mxu0 }
  0xe8   : > { %v368_v24 = vadd.f32 %v750_v23, %v692_v18  ;;  %v359_v25 = vpop.f32.mrb[3].mxu0  ;;  %v421_v27 = vmax.f32 %v365_v20, 0.0 }
  0xe9   : > { %v360_v26 = vadd.f32 %v692_v18, %v359_v25  ;;  %v419_v29 = vmax.f32 %v357_v22, 0.0 }
  0xea   : > { %v422_v28 = vmax.f32 %v368_v24, 0.0 }
  0xeb   : > { %v420_v30 = vmax.f32 %v360_v26, 0.0 }
  0xec   : > { %v436_v31 = vpack.c.bf16 %v422_v28, %v421_v27 }
  0xed   : > { %v435_v32 = vpack.c.bf16 %v420_v30, %v419_v29  ;;  %v753_v33 = vpop.f32.mrb[4].mxu0 }
  0xee   : > { %v381_v34 = vadd.f32 %v753_v33, %v692_v18  ;;  %v372_v35 = vpop.f32.mrb[5].mxu0 }
  0xef   : > { %v373_v36 = vadd.f32 %v692_v18, %v372_v35  ;;  %v754_v37 = vpop.f32.mrb[6].mxu0  ;;  %779 = vmatprep.mubr.bf16.mxu0 %v435_v32 }
  0xf0   : > { %v384_v38 = vadd.f32 %v754_v37, %v692_v18  ;;  %v375_v39 = vpop.f32.mrb[7].mxu0  ;;  %780 = vmatmul.mubr.bf16.vlgmr.msra.gmra.mrb[16].mxu0 %v436_v31  ;;  %v425_v41 = vmax.f32 %v381_v34, 0.0 }
  0xf1   : > { %v376_v40 = vadd.f32 %v692_v18, %v375_v39  ;;  %v423_v43 = vmax.f32 %v373_v36, 0.0 }
  0xf2   : > { %v426_v42 = vmax.f32 %v384_v38, 0.0 }
  0xf3   : > { %v424_v44 = vmax.f32 %v376_v40, 0.0 }
  0xf4   : > { %v438_v45 = vpack.c.bf16 %v426_v42, %v425_v41 }
  0xf5   : > { %v757_v46 = vpop.f32.mrb[8].mxu0  ;;  %v437_v47 = vpack.c.bf16 %v424_v44, %v423_v43 }
  0xf6   : > { %v397_v48 = vadd.f32 %v757_v46, %v692_v18  ;;  %v388_v49 = vpop.f32.mrb[9].mxu0 }
  0xf7   : > { %v389_v50 = vadd.f32 %v692_v18, %v388_v49  ;;  %v758_v51 = vpop.f32.mrb[10].mxu0  ;;  %783 = vmatprep.mubr.bf16.mxu1 %v437_v47 }
  0xf8   : > { %v400_v52 = vadd.f32 %v758_v51, %v692_v18  ;;  %v391_v53 = vpop.f32.mrb[11].mxu0  ;;  %784 = vmatmul.mubr.bf16.vlgmr.msra.gmra.mrb[0].mxu1 %v438_v45  ;;  %v429_v55 = vmax.f32 %v397_v48, 0.0 }
  0xf9   : > { %v392_v54 = vadd.f32 %v692_v18, %v391_v53  ;;  %v427_v57 = vmax.f32 %v389_v50, 0.0 }
  0xfa   : > { %v430_v56 = vmax.f32 %v400_v52, 0.0 }
  0xfb   : > { %v428_v58 = vmax.f32 %v392_v54, 0.0 }
  0xfc   : > { %v440_v59 = vpack.c.bf16 %v430_v56, %v429_v55 }
  0xfd   : > { %v439_v60 = vpack.c.bf16 %v428_v58, %v427_v57  ;;  %v761_v61 = vpop.f32.mrb[12].mxu0 }
  0xfe   : > { %v413_v62 = vadd.f32 %v761_v61, %v692_v18  ;;  %v404_v63 = vpop.f32.mrb[13].mxu0 }
  0xff   : > { %v405_v0 = vadd.f32 %v692_v18, %v404_v63  ;;  %v762_v1 = vpop.f32.mrb[14].mxu0  ;;  %787 = vmatprep.mubr.bf16.mxu1 %v439_v60 }
 0x100   : > { %v416_v2 = vadd.f32 %v762_v1, %v692_v18  ;;  %v407_v3 = vpop.f32.mrb[15].mxu0  ;;  %788 = vmatmul.mubr.bf16.gmra.mrb[4].mxu1 %v440_v59  ;;  %v433_v5 = vmax.f32 %v413_v62, 0.0 }
 0x101   : > { %v408_v4 = vadd.f32 %v692_v18, %v407_v3  ;;  %v431_v7 = vmax.f32 %v405_v0, 0.0 }
 0x102   : > { %v434_v6 = vmax.f32 %v416_v2, 0.0 }
 0x103   : > { %v432_v8 = vmax.f32 %v408_v4, 0.0 }
 0x104   : > { %v442_v9 = vpack.c.bf16 %v434_v6, %v433_v5 }
 0x105   : > { %v441_v10 = vpack.c.bf16 %v432_v8, %v431_v7 }
 0x107   : > { %791 = vmatprep.mubr.bf16.mxu1 %v441_v10 }
 0x108   : > { %792 = vmatmul.mubr.bf16.gmra.mrb[8].mxu1 %v442_v9 }
 0x1c3   : > { %v781_v12 = vpop.f32.mrb[16].mxu0 }
 0x1c4   : > { %v557_v13 = vadd.f32 %v781_v12, %v709_v11  ;;  %v548_v14 = vpop.f32.mrb[17].mxu0 }
 0x1c5   : > { %v549_v15 = vadd.f32 %v709_v11, %v548_v14  ;;  %v782_v16 = vpop.f32.mrb[18].mxu0 }
 0x1c6   : > { %613 = vst [vmem:[%s943_s27 + $0x10] sm:$0xff] %v557_v13  ;;  %v560_v17 = vadd.f32 %v782_v16, %v709_v11  ;;  %v551_v18 = vpop.f32.mrb[19].mxu0 }
 0x1c7   : > { %611 = vst [vmem:[%s943_s27] sm:$0xff] %v549_v15  ;;  %v552_v19 = vadd.f32 %v709_v11, %v551_v18 }
 0x1c8   : > { %614 = vst [vmem:[%s943_s27 + $0x18] sm:$0xff] %v560_v17 }
 0x1c9   : > { %612 = vst [vmem:[%s943_s27 + $0x8] sm:$0xff] %v552_v19 }
 0x1cb   : > { %v785_v20 = vpop.f32.mrb[0].mxu1 }
 0x1cc   : > { %v573_v21 = vadd.f32 %v785_v20, %v709_v11  ;;  %v564_v22 = vpop.f32.mrb[1].mxu1 }
 0x1cd   : > { %v565_v23 = vadd.f32 %v709_v11, %v564_v22  ;;  %v786_v24 = vpop.f32.mrb[2].mxu1 }
 0x1ce   : > { %617 = vst [vmem:[%s943_s27 + $0x30] sm:$0xff] %v573_v21  ;;  %v576_v25 = vadd.f32 %v786_v24, %v709_v11  ;;  %v567_v26 = vpop.f32.mrb[3].mxu1 }
 0x1cf   : > { %615 = vst [vmem:[%s943_s27 + $0x20] sm:$0xff] %v565_v23  ;;  %v568_v27 = vadd.f32 %v709_v11, %v567_v26 }
 0x1d0   : > { %618 = vst [vmem:[%s943_s27 + $0x38] sm:$0xff] %v576_v25 }
 0x1d1   : > { %616 = vst [vmem:[%s943_s27 + $0x28] sm:$0xff] %v568_v27 }
 0x1d3   : > { %v789_v28 = vpop.f32.mrb[4].mxu1 }
 0x1d4   : > { %v589_v29 = vadd.f32 %v789_v28, %v709_v11  ;;  %v580_v30 = vpop.f32.mrb[5].mxu1 }
 0x1d5   : > { %v581_v31 = vadd.f32 %v709_v11, %v580_v30  ;;  %v790_v32 = vpop.f32.mrb[6].mxu1 }
 0x1d6   : > { %621 = vst [vmem:[%s943_s27 + $0x50] sm:$0xff] %v589_v29  ;;  %v592_v33 = vadd.f32 %v790_v32, %v709_v11  ;;  %v583_v34 = vpop.f32.mrb[7].mxu1 }
 0x1d7   : > { %619 = vst [vmem:[%s943_s27 + $0x40] sm:$0xff] %v581_v31  ;;  %v584_v35 = vadd.f32 %v709_v11, %v583_v34 }
 0x1d8   : > { %622 = vst [vmem:[%s943_s27 + $0x58] sm:$0xff] %v592_v33 }
 0x1d9   : > { %620 = vst [vmem:[%s943_s27 + $0x48] sm:$0xff] %v584_v35 }
 0x1db   : > { %v793_v36 = vpop.f32.mrb[8].mxu1 }
 0x1dc   : > { %v605_v37 = vadd.f32 %v793_v36, %v709_v11  ;;  %v596_v38 = vpop.f32.mrb[9].mxu1 }
 0x1dd   : > { %v597_v39 = vadd.f32 %v709_v11, %v596_v38  ;;  %v794_v40 = vpop.f32.mrb[10].mxu1 }
 0x1de   : > { %625 = vst [vmem:[%s943_s27 + $0x70] sm:$0xff] %v605_v37  ;;  %v608_v41 = vadd.f32 %v794_v40, %v709_v11  ;;  %v599_v42 = vpop.f32.mrb[11].mxu1 }
 0x1df   : > { %623 = vst [vmem:[%s943_s27 + $0x60] sm:$0xff] %v597_v39  ;;  %v600_v43 = vadd.f32 %v709_v11, %v599_v42 }
 0x1e0   : > { %626 = vst [vmem:[%s943_s27 + $0x78] sm:$0xff] %v608_v41 }
 0x1e1   : > { %624 = vst [vmem:[%s943_s27 + $0x68] sm:$0xff] %v600_v43 }
 0x1e2 PF: > { %s15_s18 = sadd.s32 1, %s842_s18  }
 0x1e3   : > { %p12_p4 = scmp.ge.s32.totalorder %s15_s18, 4  }
 0x1e5   :  { %14 = sbr.rel (!%p12_p4) target bundleno = 1 (0x1), region = 70 }

</bundles_post_ra>
